<compile_context>
chip_gen: v7x
topology: tpu7x:2x2x1
jax: 0.10.0
libtpu: 0.0.40
codegen_flags: <defaults>
</compile_context>

<pallas_src>
import jax
import jax.numpy as jnp
from jax.experimental import pallas as pl
from jax.experimental.pallas import tpu as pltpu


def _round_up(n, m):
    return ((n + m - 1) // m) * m


def adaln_kernel(x_ref, cond_ref, w1_ref, w2_ref, b1_ref, b2_ref, o_ref):
    # x_ref:         (tn, dim)       activation tile (layer-norm path, f32 math)
    # cond_ref:      (tn, cond_dim)  conditioning tile (f32 or bf16)
    # w1_ref/w2_ref: (cond_dim, dim) pre-transposed Linear weight halves
    # b1_ref/b2_ref: (1, dim)        bias halves; "+1" already folded into b1
    x = x_ref[...].astype(jnp.float32)
    cond = cond_ref[...]

    # modulation: (weight + 1) = cond @ w1 + (b1 + 1);  bias = cond @ w2 + b2
    mod_w = jnp.dot(cond, w1_ref[...],
                    preferred_element_type=jnp.float32) + b1_ref[...]
    mod_b = jnp.dot(cond, w2_ref[...],
                    preferred_element_type=jnp.float32) + b2_ref[...]

    # layer_norm over the last dim, no affine, eps = 1e-5 (PyTorch default).
    # Two-pass mean/variance in f32 (matches F.layer_norm numerics).
    mean = jnp.mean(x, axis=-1, keepdims=True)
    centered = x - mean
    var = jnp.mean(centered * centered, axis=-1, keepdims=True)
    x_norm = centered * jax.lax.rsqrt(var + 1e-5)

    o_ref[...] = (x_norm * mod_w + mod_b).astype(o_ref.dtype)


def _build_call(N_pad, rt, dim, cond_dim, out_dtype, mm_itemsize, x_itemsize,
                single_buffer_invariant):
    grid = (N_pad // rt,)

    def inv_spec(shape):
        # Grid-invariant operand: index_map is constant, so a single VMEM
        # buffer suffices (frees VMEM for bigger row tiles).
        if single_buffer_invariant:
            return pl.BlockSpec(shape, lambda i: (0, 0),
                                pipeline_mode=pl.Buffered(1))
        return pl.BlockSpec(shape, lambda i: (0, 0))

    flops = 2 * N_pad * cond_dim * (2 * dim) + 8 * N_pad * dim
    bytes_accessed = (
        N_pad * dim * x_itemsize              # x in
        + N_pad * cond_dim * mm_itemsize      # cond in
        + 2 * cond_dim * dim * mm_itemsize    # weight halves
        + 2 * dim * 4                         # bias halves
        + N_pad * dim * x_itemsize            # out
    )

    return pl.pallas_call(
        adaln_kernel,
        out_shape=jax.ShapeDtypeStruct((N_pad, dim), out_dtype),
        grid_spec=pltpu.PrefetchScalarGridSpec(
            num_scalar_prefetch=0,
            grid=grid,
            in_specs=[
                pl.BlockSpec((rt, dim), lambda i: (i, 0)),
                pl.BlockSpec((rt, cond_dim), lambda i: (i, 0)),
                inv_spec((cond_dim, dim)),
                inv_spec((cond_dim, dim)),
                inv_spec((1, dim)),
                inv_spec((1, dim)),
            ],
            out_specs=pl.BlockSpec((rt, dim), lambda i: (i, 0)),
        ),
        compiler_params=pltpu.CompilerParams(
            dimension_semantics=("parallel",)),
        cost_estimate=pl.CostEstimate(
            flops=flops, transcendentals=N_pad,
            bytes_accessed=bytes_accessed),
    )


def adaln(x, cond, w, b, *, row_tile=256, matmul_dtype=None):
    """AdaLN forward.

    x:    (B, T, dim)
    cond: (B, T, cond_dim)
    w:    (2*dim, cond_dim)   PyTorch nn.Linear weight layout
    b:    (2*dim,)            PyTorch nn.Linear bias
    matmul_dtype: e.g. jnp.bfloat16 to feed the MXU bf16 inputs (f32 accum).
    """
    B, T, dim = x.shape
    cond_dim = cond.shape[-1]
    N = B * T

    # Row tile: as large as requested, clamped (8-aligned) to the problem.
    rt = max(8, min(_round_up(row_tile, 8), _round_up(N, 8)))
    N_pad = _round_up(N, rt)

    x2 = x.reshape(N, dim)
    c2 = cond.reshape(N, cond_dim)
    if N_pad != N:
        # Zero rows are safe: zero mean/variance -> x_norm = 0; padding is
        # sliced off below.
        x2 = jnp.pad(x2, ((0, N_pad - N), (0, 0)))
        c2 = jnp.pad(c2, ((0, N_pad - N), (0, 0)))

    # Split the projection into its two modulation halves, pre-transpose the
    # weight for the MXU, and fold the "+1" into the first bias half.
    w1 = jnp.asarray(w[:dim]).T                                   # (cond_dim, dim)
    w2 = jnp.asarray(w[dim:]).T                                   # (cond_dim, dim)
    b1 = (jnp.asarray(b[:dim], jnp.float32) + 1.0).reshape(1, dim)
    b2 = jnp.asarray(b[dim:], jnp.float32).reshape(1, dim)

    if matmul_dtype is not None:
        c2 = c2.astype(matmul_dtype)
        w1 = w1.astype(matmul_dtype)
        w2 = w2.astype(matmul_dtype)

    mm_itemsize = jnp.dtype(c2.dtype).itemsize
    x_itemsize = jnp.dtype(x.dtype).itemsize

    out = None
    for single_buf in (True, False):
        try:
            call = _build_call(N_pad, rt, dim, cond_dim, x.dtype,
                               mm_itemsize, x_itemsize, single_buf)
            out = call(x2, c2, w1, w2, b1, b2)
            break
        except Exception:
            if not single_buf:
                raise
            # pl.Buffered(1) not supported / rejected by this JAX build ->
            # fall back to default double-buffering (correctness unchanged).
            continue

    return out[:N].reshape(B, T, dim)


def adaln_ref(x, cond, w, b):
    proj = jnp.einsum("btc,dc->btd", cond.astype(jnp.float32),
                      w.astype(jnp.float32)) + b.astype(jnp.float32)
    dim = x.shape[-1]
    mod_w, mod_b = proj[..., :dim], proj[..., dim:]
    xf = x.astype(jnp.float32)
    mean = jnp.mean(xf, axis=-1, keepdims=True)
    var = jnp.mean((xf - mean) ** 2, axis=-1, keepdims=True)
    x_norm = (xf - mean) * jax.lax.rsqrt(var + 1e-5)
    return x_norm * (mod_w + 1.0) + mod_b


if __name__ == "__main__":
    key = jax.random.PRNGKey(0)
    kx, kc, kw, kb = jax.random.split(key, 4)

    B, T, dim, cond_dim = 2, 8, 32, 16
    x = jax.random.normal(kx, (B, T, dim), dtype=jnp.float32)
    cond = jax.random.normal(kc, (B, T, cond_dim), dtype=jnp.float32)

    # The module zero-inits the projection (zero_init), which would reduce
    # the forward to a plain layer_norm.  Use small deterministic non-zero
    # params so the projection path is actually exercised; set to zeros to
    # match __init__ exactly.
    w = 0.02 * jax.random.normal(kw, (2 * dim, cond_dim), dtype=jnp.float32)
    b = 0.02 * jax.random.normal(kb, (2 * dim,), dtype=jnp.float32)

    ref = adaln_ref(x, cond, w, b)

    # 1) f32 path (row tile clamps to the tiny test shape -> single step).
    out = adaln(x, cond, w, b)
    jax.block_until_ready(out)
    assert jnp.allclose(out, ref, atol=1e-5, rtol=1e-5), "f32 mismatch"

    # 2) ragged row count + multi-step grid (exercises padding + pipelining).
    B2, T2 = 2, 37                       # N = 74 -> padded to 128 with rt=64
    x_r = jax.random.normal(kx, (B2, T2, dim), dtype=jnp.float32)
    c_r = jax.random.normal(kc, (B2, T2, cond_dim), dtype=jnp.float32)
    out_r = adaln(x_r, c_r, w, b, row_tile=64)
    jax.block_until_ready(out_r)
    ref_r = adaln_ref(x_r, c_r, w, b)
    assert jnp.allclose(out_r, ref_r, atol=1e-5, rtol=1e-5), "padded mismatch"

    # 3) bf16 MXU-input path (perf option), looser tolerance vs f32 reference.
    out_bf = adaln(x, cond, w, b, matmul_dtype=jnp.bfloat16)
    jax.block_until_ready(out_bf)
    assert jnp.allclose(out_bf, ref, atol=2e-2, rtol=2e-2), "bf16 mismatch"

    print("KERNEL_OK")
</pallas_src>

<mosaic_0001>
module attributes {stable_mosaic.version = 11 : i64} {
  func.func @adaln_kernel(%arg0: i32, %arg1: memref<16x32xf32, #tpu.memory_space<vmem>>, %arg2: memref<16x16xf32, #tpu.memory_space<vmem>>, %arg3: memref<16x32xf32, #tpu.memory_space<vmem>>, %arg4: memref<16x32xf32, #tpu.memory_space<vmem>>, %arg5: memref<1x32xf32, #tpu.memory_space<vmem>>, %arg6: memref<1x32xf32, #tpu.memory_space<vmem>>, %arg7: memref<16x32xf32, #tpu.memory_space<vmem>>) attributes {dimension_semantics = [#tpu.dimension_semantics<parallel>], iteration_bounds = array<i64: 1>, scalar_prefetch = 0 : i64, scratch_operands = 0 : i64, tpu.core_type = #tpu.core_type<tc>, window_params = [{transform_indices = @transform_0, window_bounds = array<i64: 16, 32>}, {transform_indices = @transform_1, window_bounds = array<i64: 16, 16>}, {pipeline_mode = #tpu.pipeline_mode<synchronous>, transform_indices = @transform_2, window_bounds = array<i64: 16, 32>}, {pipeline_mode = #tpu.pipeline_mode<synchronous>, transform_indices = @transform_3, window_bounds = array<i64: 16, 32>}, {pipeline_mode = #tpu.pipeline_mode<synchronous>, transform_indices = @transform_4, window_bounds = array<i64: 1, 32>}, {pipeline_mode = #tpu.pipeline_mode<synchronous>, transform_indices = @transform_5, window_bounds = array<i64: 1, 32>}, {transform_indices = @transform_6, window_bounds = array<i64: 16, 32>}]} {
    %c0 = arith.constant 0 : index
    %c0_0 = arith.constant 0 : index
    %0 = vector.load %arg1[%c0, %c0_0] : memref<16x32xf32, #tpu.memory_space<vmem>>, vector<16x32xf32>
    %c0_1 = arith.constant 0 : index
    %c0_2 = arith.constant 0 : index
    %1 = vector.load %arg2[%c0_1, %c0_2] : memref<16x16xf32, #tpu.memory_space<vmem>>, vector<16x16xf32>
    %c0_3 = arith.constant 0 : index
    %c0_4 = arith.constant 0 : index
    %2 = vector.load %arg3[%c0_3, %c0_4] : memref<16x32xf32, #tpu.memory_space<vmem>>, vector<16x32xf32>
    %cst = arith.constant dense<0.000000e+00> : vector<16x32xf32>
    %3 = tpu.matmul %1, %2, %cst {dimension_numbers = #tpu.dot_dimension_numbers<[1], [0], [0], [1], [0, 0, 1, 1], [], []>} : vector<16x16xf32>, vector<16x32xf32>, vector<16x32xf32> -> vector<16x32xf32>
    %c0_5 = arith.constant 0 : index
    %c0_6 = arith.constant 0 : index
    %4 = vector.load %arg5[%c0_5, %c0_6] : memref<1x32xf32, #tpu.memory_space<vmem>>, vector<1x32xf32>
    %5 = vector.broadcast %4 : vector<1x32xf32> to vector<16x32xf32>
    %6 = arith.addf %3, %5 : vector<16x32xf32>
    %c0_7 = arith.constant 0 : index
    %c0_8 = arith.constant 0 : index
    %7 = vector.load %arg4[%c0_7, %c0_8] : memref<16x32xf32, #tpu.memory_space<vmem>>, vector<16x32xf32>
    %cst_9 = arith.constant dense<0.000000e+00> : vector<16x32xf32>
    %8 = tpu.matmul %1, %7, %cst_9 {dimension_numbers = #tpu.dot_dimension_numbers<[1], [0], [0], [1], [0, 0, 1, 1], [], []>} : vector<16x16xf32>, vector<16x32xf32>, vector<16x32xf32> -> vector<16x32xf32>
    %c0_10 = arith.constant 0 : index
    %c0_11 = arith.constant 0 : index
    %9 = vector.load %arg6[%c0_10, %c0_11] : memref<1x32xf32, #tpu.memory_space<vmem>>, vector<1x32xf32>
    %10 = vector.broadcast %9 : vector<1x32xf32> to vector<16x32xf32>
    %11 = arith.addf %8, %10 : vector<16x32xf32>
    %cst_12 = arith.constant dense<0.000000e+00> : vector<16xf32>
    %12 = vector.multi_reduction <add>, %0, %cst_12 [1] : vector<16x32xf32> to vector<16xf32>
    %13 = vector.shape_cast %12 : vector<16xf32> to vector<16x1xf32>
    %cst_13 = arith.constant 3.200000e+01 : f32
    %14 = vector.broadcast %cst_13 : f32 to vector<16x1xf32>
    %15 = arith.divf %13, %14 : vector<16x1xf32>
    %16 = vector.broadcast %15 : vector<16x1xf32> to vector<16x32xf32>
    %17 = arith.subf %0, %16 : vector<16x32xf32>
    %18 = arith.mulf %17, %17 : vector<16x32xf32>
    %cst_14 = arith.constant dense<0.000000e+00> : vector<16xf32>
    %19 = vector.multi_reduction <add>, %18, %cst_14 [1] : vector<16x32xf32> to vector<16xf32>
    %20 = vector.shape_cast %19 : vector<16xf32> to vector<16x1xf32>
    %cst_15 = arith.constant 3.200000e+01 : f32
    %21 = vector.broadcast %cst_15 : f32 to vector<16x1xf32>
    %22 = arith.divf %20, %21 : vector<16x1xf32>
    %cst_16 = arith.constant 9.99999974E-6 : f32
    %23 = vector.broadcast %cst_16 : f32 to vector<16x1xf32>
    %24 = arith.addf %22, %23 : vector<16x1xf32>
    %25 = math.rsqrt %24 : vector<16x1xf32>
    %26 = vector.broadcast %25 : vector<16x1xf32> to vector<16x32xf32>
    %27 = arith.mulf %17, %26 : vector<16x32xf32>
    %28 = arith.mulf %27, %6 : vector<16x32xf32>
    %29 = arith.addf %28, %11 : vector<16x32xf32>
    %c0_17 = arith.constant 0 : index
    %c0_18 = arith.constant 0 : index
    %30 = vector.load %arg7[%c0_17, %c0_18] : memref<16x32xf32, #tpu.memory_space<vmem>>, vector<16x32xf32>
    tpu.vector_store %arg7[%c0_17, %c0_18], %29 {strides = array<i32>} : memref<16x32xf32, #tpu.memory_space<vmem>>, vector<16x32xf32>,
    return
  }
  func.func @transform_0(%arg0: i32) -> (i32, i32) {
    %c0_i32 = arith.constant 0 : i32
    %c0_i32_0 = arith.constant 0 : i32
    return %arg0, %c0_i32 : i32, i32
  }
  func.func @transform_1(%arg0: i32) -> (i32, i32) {
    %c0_i32 = arith.constant 0 : i32
    %c0_i32_0 = arith.constant 0 : i32
    return %arg0, %c0_i32 : i32, i32
  }
  func.func @transform_2(%arg0: i32) -> (i32, i32) {
    %c0_i32 = arith.constant 0 : i32
    %c0_i32_0 = arith.constant 0 : i32
    %c0_i32_1 = arith.constant 0 : i32
    return %c0_i32, %c0_i32_0 : i32, i32
  }
  func.func @transform_3(%arg0: i32) -> (i32, i32) {
    %c0_i32 = arith.constant 0 : i32
    %c0_i32_0 = arith.constant 0 : i32
    %c0_i32_1 = arith.constant 0 : i32
    return %c0_i32, %c0_i32_0 : i32, i32
  }
  func.func @transform_4(%arg0: i32) -> (i32, i32) {
    %c0_i32 = arith.constant 0 : i32
    %c0_i32_0 = arith.constant 0 : i32
    %c0_i32_1 = arith.constant 0 : i32
    return %c0_i32, %c0_i32_0 : i32, i32
  }
  func.func @transform_5(%arg0: i32) -> (i32, i32) {
    %c0_i32 = arith.constant 0 : i32
    %c0_i32_0 = arith.constant 0 : i32
    %c0_i32_1 = arith.constant 0 : i32
    return %c0_i32, %c0_i32_0 : i32, i32
  }
  func.func @transform_6(%arg0: i32) -> (i32, i32) {
    %c0_i32 = arith.constant 0 : i32
    %c0_i32_0 = arith.constant 0 : i32
    return %arg0, %c0_i32 : i32, i32
  }
}

module attributes {stable_mosaic.version = 11 : i64} {
  func.func @adaln_kernel(%arg0: i32, %arg1: memref<16x32xf32, #tpu.memory_space<vmem>>, %arg2: memref<16x16xf32, #tpu.memory_space<vmem>>, %arg3: memref<16x32xf32, #tpu.memory_space<vmem>>, %arg4: memref<16x32xf32, #tpu.memory_space<vmem>>, %arg5: memref<1x32xf32, #tpu.memory_space<vmem>>, %arg6: memref<1x32xf32, #tpu.memory_space<vmem>>, %arg7: memref<16x32xf32, #tpu.memory_space<vmem>>) attributes {dimension_semantics = [#tpu.dimension_semantics<parallel>], iteration_bounds = array<i64: 1>, scalar_prefetch = 0 : i64, scratch_operands = 0 : i64, tpu.core_type = #tpu.core_type<tc>, window_params = [{transform_indices = @transform_0, window_bounds = array<i64: 16, 32>}, {transform_indices = @transform_1, window_bounds = array<i64: 16, 16>}, {pipeline_mode = #tpu.pipeline_mode<synchronous>, transform_indices = @transform_2, window_bounds = array<i64: 16, 32>}, {pipeline_mode = #tpu.pipeline_mode<synchronous>, transform_indices = @transform_3, window_bounds = array<i64: 16, 32>}, {pipeline_mode = #tpu.pipeline_mode<synchronous>, transform_indices = @transform_4, window_bounds = array<i64: 1, 32>}, {pipeline_mode = #tpu.pipeline_mode<synchronous>, transform_indices = @transform_5, window_bounds = array<i64: 1, 32>}, {transform_indices = @transform_6, window_bounds = array<i64: 16, 32>}]} {
    %c0 = arith.constant 0 : index
    %c0_0 = arith.constant 0 : index
    %0 = vector.load %arg1[%c0, %c0_0] : memref<16x32xf32, #tpu.memory_space<vmem>>, vector<16x32xf32>
    %c0_1 = arith.constant 0 : index
    %c0_2 = arith.constant 0 : index
    %1 = vector.load %arg2[%c0_1, %c0_2] : memref<16x16xf32, #tpu.memory_space<vmem>>, vector<16x16xf32>
    %c0_3 = arith.constant 0 : index
    %c0_4 = arith.constant 0 : index
    %2 = vector.load %arg3[%c0_3, %c0_4] : memref<16x32xf32, #tpu.memory_space<vmem>>, vector<16x32xf32>
    %cst = arith.constant dense<0.000000e+00> : vector<16x32xf32>
    %3 = tpu.matmul %1, %2, %cst {dimension_numbers = #tpu.dot_dimension_numbers<[1], [0], [0], [1], [0, 0, 1, 1], [], []>} : vector<16x16xf32>, vector<16x32xf32>, vector<16x32xf32> -> vector<16x32xf32>
    %c0_5 = arith.constant 0 : index
    %c0_6 = arith.constant 0 : index
    %4 = vector.load %arg5[%c0_5, %c0_6] : memref<1x32xf32, #tpu.memory_space<vmem>>, vector<1x32xf32>
    %5 = vector.broadcast %4 : vector<1x32xf32> to vector<16x32xf32>
    %6 = arith.addf %3, %5 : vector<16x32xf32>
    %c0_7 = arith.constant 0 : index
    %c0_8 = arith.constant 0 : index
    %7 = vector.load %arg4[%c0_7, %c0_8] : memref<16x32xf32, #tpu.memory_space<vmem>>, vector<16x32xf32>
    %cst_9 = arith.constant dense<0.000000e+00> : vector<16x32xf32>
    %8 = tpu.matmul %1, %7, %cst_9 {dimension_numbers = #tpu.dot_dimension_numbers<[1], [0], [0], [1], [0, 0, 1, 1], [], []>} : vector<16x16xf32>, vector<16x32xf32>, vector<16x32xf32> -> vector<16x32xf32>
    %c0_10 = arith.constant 0 : index
    %c0_11 = arith.constant 0 : index
    %9 = vector.load %arg6[%c0_10, %c0_11] : memref<1x32xf32, #tpu.memory_space<vmem>>, vector<1x32xf32>
    %10 = vector.broadcast %9 : vector<1x32xf32> to vector<16x32xf32>
    %11 = arith.addf %8, %10 : vector<16x32xf32>
    %cst_12 = arith.constant dense<0.000000e+00> : vector<16xf32>
    %12 = vector.multi_reduction <add>, %0, %cst_12 [1] : vector<16x32xf32> to vector<16xf32>
    %13 = vector.shape_cast %12 : vector<16xf32> to vector<16x1xf32>
    %cst_13 = arith.constant 3.200000e+01 : f32
    %14 = vector.broadcast %cst_13 : f32 to vector<16x1xf32>
    %15 = arith.divf %13, %14 : vector<16x1xf32>
    %16 = vector.broadcast %15 : vector<16x1xf32> to vector<16x32xf32>
    %17 = arith.subf %0, %16 : vector<16x32xf32>
    %18 = arith.mulf %17, %17 : vector<16x32xf32>
    %cst_14 = arith.constant dense<0.000000e+00> : vector<16xf32>
    %19 = vector.multi_reduction <add>, %18, %cst_14 [1] : vector<16x32xf32> to vector<16xf32>
    %20 = vector.shape_cast %19 : vector<16xf32> to vector<16x1xf32>
    %cst_15 = arith.constant 3.200000e+01 : f32
    %21 = vector.broadcast %cst_15 : f32 to vector<16x1xf32>
    %22 = arith.divf %20, %21 : vector<16x1xf32>
    %cst_16 = arith.constant 9.99999974E-6 : f32
    %23 = vector.broadcast %cst_16 : f32 to vector<16x1xf32>
    %24 = arith.addf %22, %23 : vector<16x1xf32>
    %25 = math.rsqrt %24 : vector<16x1xf32>
    %26 = vector.broadcast %25 : vector<16x1xf32> to vector<16x32xf32>
    %27 = arith.mulf %17, %26 : vector<16x32xf32>
    %28 = arith.mulf %27, %6 : vector<16x32xf32>
    %29 = arith.addf %28, %11 : vector<16x32xf32>
    %c0_17 = arith.constant 0 : index
    %c0_18 = arith.constant 0 : index
    %30 = vector.load %arg7[%c0_17, %c0_18] : memref<16x32xf32, #tpu.memory_space<vmem>>, vector<16x32xf32>
    tpu.vector_store %arg7[%c0_17, %c0_18], %29 {strides = array<i32>} : memref<16x32xf32, #tpu.memory_space<vmem>>, vector<16x32xf32>,
    return
  }
  func.func @transform_0(%arg0: i32) -> (i32, i32) {
    %c0_i32 = arith.constant 0 : i32
    %c0_i32_0 = arith.constant 0 : i32
    return %arg0, %c0_i32 : i32, i32
  }
  func.func @transform_1(%arg0: i32) -> (i32, i32) {
    %c0_i32 = arith.constant 0 : i32
    %c0_i32_0 = arith.constant 0 : i32
    return %arg0, %c0_i32 : i32, i32
  }
  func.func @transform_2(%arg0: i32) -> (i32, i32) {
    %c0_i32 = arith.constant 0 : i32
    %c0_i32_0 = arith.constant 0 : i32
    %c0_i32_1 = arith.constant 0 : i32
    return %c0_i32, %c0_i32_0 : i32, i32
  }
  func.func @transform_3(%arg0: i32) -> (i32, i32) {
    %c0_i32 = arith.constant 0 : i32
    %c0_i32_0 = arith.constant 0 : i32
    %c0_i32_1 = arith.constant 0 : i32
    return %c0_i32, %c0_i32_0 : i32, i32
  }
  func.func @transform_4(%arg0: i32) -> (i32, i32) {
    %c0_i32 = arith.constant 0 : i32
    %c0_i32_0 = arith.constant 0 : i32
    %c0_i32_1 = arith.constant 0 : i32
    return %c0_i32, %c0_i32_0 : i32, i32
  }
  func.func @transform_5(%arg0: i32) -> (i32, i32) {
    %c0_i32 = arith.constant 0 : i32
    %c0_i32_0 = arith.constant 0 : i32
    %c0_i32_1 = arith.constant 0 : i32
    return %c0_i32, %c0_i32_0 : i32, i32
  }
  func.func @transform_6(%arg0: i32) -> (i32, i32) {
    %c0_i32 = arith.constant 0 : i32
    %c0_i32_0 = arith.constant 0 : i32
    return %arg0, %c0_i32 : i32, i32
  }
}

</mosaic_0001>

<bundles_post_ra>
// kernel: tpu_custom_call.1
= control target key start
LH: loop header
LB: loop body
LE: loop exit
PB: predicated region body
PF: predicated region fallthrough
CT: control target
= control target key end

     0   :  { %11 = vsyncpa [#allocation3], 0  ;;  %s623_s0 = inlined_call_operand.hbm [shape: f32[16,32], index: 0, kind: input, shape index: {}]   ;;  %s624_s1 = inlined_call_operand.hbm [shape: f32[16,16], index: 1, kind: input, shape index: {}]   ;;  %s625_s2 = inlined_call_operand.hbm [shape: f32[16,32], index: 2, kind: input, shape index: {}]   ;;  %s626_s3 = inlined_call_operand.hbm [shape: f32[16,32], index: 3, kind: input, shape index: {}]   ;;  %s627_s4 = inlined_call_operand.vmem [shape: f32[1,32], index: 4, kind: input, shape index: {}]   ;;  %s628_s5 = inlined_call_operand.vmem [shape: f32[1,32], index: 5, kind: input, shape index: {}]   ;;  %s629_s6 = inlined_call_operand.hbm [shape: f32[16,32], index: 6, kind: output, shape index: {}]  }
   0x1   :  { %12 = vsyncpa [#allocation6], 0 }
   0x2   :  { %13 = vsyncpa [#allocation9], 0 }
   0x3   :  { %14 = vsyncpa [#allocation4], 0  ;;  %s476_s21 = smov [#allocation5]   ;;  %s477_s23 = smov [#allocation2]  }
   0x4   :  { %s32_s22 = sshll.u32 %s476_s21, 4  ;;  %s20_s24 = sshll.u32 %s477_s23, 4  ;;  %s33_s22 = int_to_ptr.vmem [resolvable:$true] %s32_s22  ;;  %s518_s24 = int_to_ptr.vmem [resolvable:$true] %s20_s24 }
   0x5   :  { %s358_s27 = scalar_lea.hbm %s624_s1, 256 }
   0x6   :  { %p359_p0 = scmp.ne.s32.totalorder %s624_s1, %s358_s27  ;;  %p362_p1 = scmp.lt.u32.totalorder %s358_s27, %s624_s1 }
   0x8   :  { %p364_p2 = pnand %p362_p1, %p359_p0 }
   0xa   :  { %367 = shalt.err (!%p364_p2)
}
   0xb   :  { %s368_s8 = scalar_lea.vmem %s33_s22, 256  ;;  %p373_p4 = scmp.lt.s32.totalorder %s33_s22, %s33_s22 }
   0xc   :  { %p369_p3 = scmp.ne.s32.totalorder %s33_s22, %s368_s8  ;;  %p374_p5 = scmp.lt.s32.totalorder %s368_s8, %s368_s8 }
   0xe   :  { %p375_p6 = por %p374_p5, %p373_p4 }
  0x10   :  { %p376_p7 = pnand %p375_p6, %p369_p3 }
  0x12   :  { %379 = shalt.err (!%p376_p7)
}
  0x13   :  { %s478_s9 = smov 128   ;;  %s479_s10 = smov 8  }
  0x14   :  { %38 = dma.hbm_to_vmem [thread:$0]  %s624_s1, 256, %s33_s22, [#allocation6], %s478_s9, %s478_s9, %s479_s10  }
  0x15   :  { %s380_s15 = scalar_lea.hbm %s623_s0, 256 }
  0x16   :  { %p381_p8 = scmp.ne.s32.totalorder %s623_s0, %s380_s15  ;;  %p384_p9 = scmp.lt.u32.totalorder %s380_s15, %s623_s0 }
  0x18   :  { %p386_p10 = pnand %p384_p9, %p381_p8 }
  0x1a   :  { %389 = shalt.err (!%p386_p10)
}
  0x1b   :  { %s390_s20 = scalar_lea.vmem %s518_s24, 256  ;;  %p395_p12 = scmp.lt.s32.totalorder %s518_s24, %s518_s24 }
  0x1c   :  { %p391_p11 = scmp.ne.s32.totalorder %s518_s24, %s390_s20  ;;  %p396_p13 = scmp.lt.s32.totalorder %s390_s20, %s390_s20 }
  0x1e   :  { %p397_p0 = por %p396_p13, %p395_p12 }
  0x20   :  { %p398_p1 = pnand %p397_p0, %p391_p11 }
  0x22   :  { %401 = shalt.err (!%p398_p1)
}
  0x23   :  { %26 = dma.hbm_to_vmem [thread:$0]  %s623_s0, 256, %s518_s24, [#allocation3], %s478_s9, %s478_s9, %s479_s10  }
  0x24   :  { %s480_s22 = smov [#allocation7]   ;;  %s481_s25 = smov [#allocation8]  }
  0x25   :  { %s44_s23 = sshll.u32 %s480_s22, 4  ;;  %s56_s26 = sshll.u32 %s481_s25, 4  ;;  %s45_s23 = int_to_ptr.vmem [resolvable:$true] %s44_s23  ;;  %s555_s26 = int_to_ptr.vmem [resolvable:$true] %s56_s26 }
  0x26   :  { %s402_s29 = scalar_lea.hbm %s625_s2, 256 }
  0x27   :  { %p403_p2 = scmp.ne.s32.totalorder %s625_s2, %s402_s29  ;;  %p406_p3 = scmp.lt.u32.totalorder %s402_s29, %s625_s2 }
  0x29   :  { %p408_p4 = pnand %p406_p3, %p403_p2 }
  0x2b   :  { %411 = shalt.err (!%p408_p4)
}
  0x2c   :  { %s412_s0 = scalar_lea.vmem %s45_s23, 256  ;;  %p417_p6 = scmp.lt.s32.totalorder %s45_s23, %s45_s23 }
  0x2d   :  { %p413_p5 = scmp.ne.s32.totalorder %s45_s23, %s412_s0  ;;  %p418_p7 = scmp.lt.s32.totalorder %s412_s0, %s412_s0 }
  0x2f   :  { %p419_p8 = por %p418_p7, %p417_p6 }
  0x31   :  { %p420_p9 = pnand %p419_p8, %p413_p5 }
  0x33   :  { %423 = shalt.err (!%p420_p9)
}
  0x34   :  { %50 = dma.hbm_to_vmem [thread:$0]  %s625_s2, 256, %s45_s23, [#allocation6], %s478_s9, %s478_s9, %s479_s10  }
  0x35   :  { %s424_s15 = scalar_lea.hbm %s626_s3, 256 }
  0x36   :  { %p425_p10 = scmp.ne.s32.totalorder %s626_s3, %s424_s15  ;;  %p428_p11 = scmp.lt.u32.totalorder %s424_s15, %s626_s3 }
  0x38   :  { %p430_p12 = pnand %p428_p11, %p425_p10 }
  0x3a   :  { %433 = shalt.err (!%p430_p12)
}
  0x3b   :  { %s434_s20 = scalar_lea.vmem %s555_s26, 256  ;;  %p439_p0 = scmp.lt.s32.totalorder %s555_s26, %s555_s26 }
  0x3c   :  { %p435_p13 = scmp.ne.s32.totalorder %s555_s26, %s434_s20  ;;  %p440_p1 = scmp.lt.s32.totalorder %s434_s20, %s434_s20 }
  0x3e   :  { %p441_p2 = por %p440_p1, %p439_p0 }
  0x40   :  { %p442_p3 = pnand %p441_p2, %p435_p13 }
  0x42   :  { %445 = shalt.err (!%p442_p3)
}
  0x43   :  { %62 = dma.hbm_to_vmem [thread:$0]  %s626_s3, 256, %s555_s26, [#allocation9], %s478_s9, %s478_s9, %s479_s10  }
  0x44   :  { %468 = dma.done.wait [#allocation3], 256  }
  0x45   :  { %469 = vsyncadd [#allocation3], 4294967040 }
  0x46   :  { %470 = dma.done.wait [#allocation6], 512  }
  0x47   :  { %471 = vsyncadd [#allocation6], 4294966784 }
  0x48   :  { %472 = dma.done.wait [#allocation9], 256  }
  0x49   :  { %473 = vsyncadd [#allocation9], 4294967040  ;;  %vm258_vm0 = vcmask 261120   ;;  %v79_v0 = vld [vmem:[#allocation2] sm:$0xff]  ;;  %v80_v1 = vld [vmem:[#allocation2 + $0x8] sm:$0xff]  ;;  %vm92_vm1 = vcmask 130048  }
  0x4a   :  { %v83_v2 = vld [vmem:[#allocation7] sm:$0xff]  ;;  %v259_v3 = vsel %vm258_vm0, %v79_v0, 0.0  ;;  %v84_v4 = vld [vmem:[#allocation7 + $0x8] sm:$0xff]  ;;  %v174_v5 = vld [vmem:[#allocation8] sm:$0xff]  ;;  %v262_v10 = vsel %vm258_vm0, %v80_v1, 0.0  ;;  %s482_s25 = smov [#allocation10]  }
  0x4b   :  { %v175_v6 = vld [vmem:[#allocation8 + $0x8] sm:$0xff]  ;;  %260 = vadd.xlane.f32.xlu0 %v259_v3  ;;  %v339_v7 = vpack.c.bf16 %v84_v4, %v83_v2  ;;  %v81_v9 = vld [vmem:[#allocation5] sm:$0xff]  ;;  %v311_v32 = vld [vmem:[%s627_s4] ss:$0 sm:$0xff]  ;;  %s297_s26 = sshll.u32 %s482_s25, 4  ;;  %s298_s26 = int_to_ptr.vmem [resolvable:$true] %s297_s26 }
  0x4c   :  { %v343_v8 = vpack.c.bf16 %v175_v6, %v174_v5  ;;  %329 = vmatprep.mubr.msk.f32.mxu0 %vm92_vm1, %v81_v9  ;;  %336 = vmatprep.mubr.msk.f32.mxu1 %vm92_vm1, %v81_v9  ;;  %v82_v11 = vld [vmem:[#allocation5 + $0x8] sm:$0xff]  ;;  %v314_v33 = vld [vmem:[%s628_s5] ss:$0 sm:$0xff]  ;;  %s446_s4 = scalar_lea.vmem %s298_s26, 256  ;;  %p451_p5 = scmp.lt.s32.totalorder %s298_s26, %s298_s26 }
  0x4d   :  { %340 = vmatprep.subr.bf16.mxu0 %v339_v7  ;;  %p447_p4 = scmp.ne.s32.totalorder %s298_s26, %s446_s4  ;;  %p452_p6 = scmp.lt.s32.totalorder %s446_s4, %s446_s4 }
  0x4e   :  { %344 = vmatprep.subr.bf16.mxu1 %v343_v8  ;;  %342 = vmatpush3.bf16.msra.mxu0 %v339_v7 }
  0x4f   :  { %346 = vmatpush3.bf16.msra.mxu1 %v343_v8  ;;  %263 = vadd.xlane.f32.xlu0 %v262_v10  ;;  %p453_p7 = por %p452_p6, %p451_p5 }
  0x51   :  { %330 = vmatmul.mubr.msk.f32.vlgmr.msra.gmra.mrb[0].mxu0 %vm92_vm1, %v82_v11  ;;  %p454_p8 = pnand %p453_p7, %p447_p4 }
  0x52   :  { %337 = vmatmul.mubr.msk.f32.vlgmr.msra.gmra.mrb[0].mxu1 %vm92_vm1, %v82_v11 }
  0xd8   :  { %v261_v12 = vpop.xlane.xlu0 %260 }
  0xd9   :  { %v266_v13 = vmul.f32 0.03125, %v261_v12 }
  0xdb   :  { %v268_v14 = vsub.f32 %v79_v0, %v266_v13 }
  0xdc   :  { %v264_v15 = vpop.xlane.xlu0 %263 }
  0xdd   :  { %v267_v16 = vmul.f32 0.03125, %v264_v15  ;;  %v270_v17 = vmul.f32 %v268_v14, %v268_v14 }
  0xdf   :  { %v269_v18 = vsub.f32 %v80_v1, %v267_v16  ;;  %v272_v19 = vsel %vm258_vm0, %v270_v17, 0.0 }
  0xe0   :  { %273 = vadd.xlane.f32.xlu1 %v272_v19 }
  0xe1   :  { %v271_v20 = vmul.f32 %v269_v18, %v269_v18 }
  0xe3   :  { %v275_v21 = vsel %vm258_vm0, %v271_v20, 0.0 }
  0xe4   :  { %276 = vadd.xlane.f32.xlu1 %v275_v21 }
 0x124   :  { %v331_v22 = vpop.f32.mrb[0].mxu0 }
 0x125   :  { %v338_v23 = vpop.f32.mrb[0].mxu1  ;;  %v165_v24 = vpop.f32.mrb[1].mxu0  ;;  %v171_v38 = vadd.f32 %v331_v22, %v311_v32 }
 0x126   :  { %v249_v25 = vpop.f32.mrb[1].mxu1  ;;  %v166_v34 = vadd.f32 %v311_v32, %v165_v24  ;;  %v255_v42 = vadd.f32 %v338_v23, %v314_v33 }
 0x127   :  { %v250_v37 = vadd.f32 %v314_v33, %v249_v25 }
 0x16d   :  { %v274_v26 = vpop.xlane.xlu1 %273 }
 0x16e   :  { %v278_v27 = vmul.f32 0.03125, %v274_v26 }
 0x170   :  { %v280_v28 = vadd.f32 1e-05, %v278_v27 }
 0x171   :  { %v277_v29 = vpop.xlane.xlu1 %276 }
 0x172   :  { %354 = vrsqrt.f32 %v280_v28  ;;  %v279_v30 = vmul.f32 0.03125, %v277_v29 }
 0x174   :  { %v281_v31 = vadd.f32 1e-05, %v279_v30 }
 0x176   :  { %356 = vrsqrt.f32 %v281_v31 }
 0x17c   :  { %v355_v35 = vpop.eup %354 }
 0x17d   :  { %v284_v36 = vmul.f32 %v355_v35, %v268_v14 }
 0x17f   :  { %v286_v39 = vmul.f32 %v284_v36, %v166_v34 }
 0x180   :  { %v357_v40 = vpop.eup %356 }
 0x181   :  { %v285_v41 = vmul.f32 %v357_v40, %v269_v18  ;;  %v288_v43 = vadd.f32 %v286_v39, %v250_v37 }
 0x183   :  { %v287_v44 = vmul.f32 %v285_v41, %v171_v38  ;;  %290 = vst.msk [vmem:[#allocation10] sm:$0xff] %vm258_vm0, %v288_v43 }
 0x185   :  { %v289_v45 = vadd.f32 %v287_v44, %v255_v42 }
 0x187   :  { %291 = vst.msk [vmem:[#allocation10 + $0x8] sm:$0xff] %vm258_vm0, %v289_v45 }
 0x188   :  { %457 = shalt.err (!%p454_p8)
}
 0x189   :  { %s458_s28 = scalar_lea.hbm %s629_s6, 256 }
 0x18a   :  { %p459_p9 = scmp.ne.s32.totalorder %s629_s6, %s458_s28  ;;  %p462_p10 = scmp.lt.u32.totalorder %s458_s28, %s629_s6 }
 0x18c   :  { %p464_p11 = pnand %p462_p10, %p459_p9 }
 0x18e   :  { %467 = shalt.err (!%p464_p11)
}
 0x18f   :  { %303 = dma.vmem_to_hbm [thread:$0]  %s298_s26, 256, %s629_s6, [#allocation4], %s478_s9, %s478_s9, %s479_s10  }
 0x190   :  { %474 = dma.done.wait [#allocation4], 256  }
 0x191   :  { %475 = vsyncadd [#allocation4], 4294967040 }
 0x192   :  { %307 = vsyncpa [#allocation3], 1 }
 0x193   :  { %308 = vsyncpa [#allocation6], 1 }
 0x194   :  { %309 = vsyncpa [#allocation9], 1 }
 0x195   :  { %310 = vsyncpa [#allocation4], 1 }

// kernel: tpu_custom_call.1
= control target key start
LH: loop header
LB: loop body
LE: loop exit
PB: predicated region body
PF: predicated region fallthrough
CT: control target
= control target key end

     0   :  { %11 = vsyncpa [#allocation3], 0  ;;  %s623_s0 = inlined_call_operand.hbm [shape: f32[16,32], index: 0, kind: input, shape index: {}]   ;;  %s624_s1 = inlined_call_operand.hbm [shape: f32[16,16], index: 1, kind: input, shape index: {}]   ;;  %s625_s2 = inlined_call_operand.hbm [shape: f32[16,32], index: 2, kind: input, shape index: {}]   ;;  %s626_s3 = inlined_call_operand.hbm [shape: f32[16,32], index: 3, kind: input, shape index: {}]   ;;  %s627_s4 = inlined_call_operand.vmem [shape: f32[1,32], index: 4, kind: input, shape index: {}]   ;;  %s628_s5 = inlined_call_operand.vmem [shape: f32[1,32], index: 5, kind: input, shape index: {}]   ;;  %s629_s6 = inlined_call_operand.hbm [shape: f32[16,32], index: 6, kind: output, shape index: {}]  }
   0x1   :  { %12 = vsyncpa [#allocation6], 0 }
   0x2   :  { %13 = vsyncpa [#allocation9], 0 }
   0x3   :  { %14 = vsyncpa [#allocation4], 0  ;;  %s476_s21 = smov [#allocation5]   ;;  %s477_s23 = smov [#allocation2]  }
   0x4   :  { %s32_s22 = sshll.u32 %s476_s21, 4  ;;  %s20_s24 = sshll.u32 %s477_s23, 4  ;;  %s33_s22 = int_to_ptr.vmem [resolvable:$true] %s32_s22  ;;  %s518_s24 = int_to_ptr.vmem [resolvable:$true] %s20_s24 }
   0x5   :  { %s358_s27 = scalar_lea.hbm %s624_s1, 256 }
   0x6   :  { %p359_p0 = scmp.ne.s32.totalorder %s624_s1, %s358_s27  ;;  %p362_p1 = scmp.lt.u32.totalorder %s358_s27, %s624_s1 }
   0x8   :  { %p364_p2 = pnand %p362_p1, %p359_p0 }
   0xa   :  { %367 = shalt.err (!%p364_p2)
}
   0xb   :  { %s368_s8 = scalar_lea.vmem %s33_s22, 256  ;;  %p373_p4 = scmp.lt.s32.totalorder %s33_s22, %s33_s22 }
   0xc   :  { %p369_p3 = scmp.ne.s32.totalorder %s33_s22, %s368_s8  ;;  %p374_p5 = scmp.lt.s32.totalorder %s368_s8, %s368_s8 }
   0xe   :  { %p375_p6 = por %p374_p5, %p373_p4 }
  0x10   :  { %p376_p7 = pnand %p375_p6, %p369_p3 }
  0x12   :  { %379 = shalt.err (!%p376_p7)
}
  0x13   :  { %s478_s9 = smov 128   ;;  %s479_s10 = smov 8  }
  0x14   :  { %38 = dma.hbm_to_vmem [thread:$0]  %s624_s1, 256, %s33_s22, [#allocation6], %s478_s9, %s478_s9, %s479_s10  }
  0x15   :  { %s380_s15 = scalar_lea.hbm %s623_s0, 256 }
  0x16   :  { %p381_p8 = scmp.ne.s32.totalorder %s623_s0, %s380_s15  ;;  %p384_p9 = scmp.lt.u32.totalorder %s380_s15, %s623_s0 }
  0x18   :  { %p386_p10 = pnand %p384_p9, %p381_p8 }
  0x1a   :  { %389 = shalt.err (!%p386_p10)
}
  0x1b   :  { %s390_s20 = scalar_lea.vmem %s518_s24, 256  ;;  %p395_p12 = scmp.lt.s32.totalorder %s518_s24, %s518_s24 }
  0x1c   :  { %p391_p11 = scmp.ne.s32.totalorder %s518_s24, %s390_s20  ;;  %p396_p13 = scmp.lt.s32.totalorder %s390_s20, %s390_s20 }
  0x1e   :  { %p397_p0 = por %p396_p13, %p395_p12 }
  0x20   :  { %p398_p1 = pnand %p397_p0, %p391_p11 }
  0x22   :  { %401 = shalt.err (!%p398_p1)
}
  0x23   :  { %26 = dma.hbm_to_vmem [thread:$0]  %s623_s0, 256, %s518_s24, [#allocation3], %s478_s9, %s478_s9, %s479_s10  }
  0x24   :  { %s480_s22 = smov [#allocation7]   ;;  %s481_s25 = smov [#allocation8]  }
  0x25   :  { %s44_s23 = sshll.u32 %s480_s22, 4  ;;  %s56_s26 = sshll.u32 %s481_s25, 4  ;;  %s45_s23 = int_to_ptr.vmem [resolvable:$true] %s44_s23  ;;  %s555_s26 = int_to_ptr.vmem [resolvable:$true] %s56_s26 }
  0x26   :  { %s402_s29 = scalar_lea.hbm %s625_s2, 256 }
  0x27   :  { %p403_p2 = scmp.ne.s32.totalorder %s625_s2, %s402_s29  ;;  %p406_p3 = scmp.lt.u32.totalorder %s402_s29, %s625_s2 }
  0x29   :  { %p408_p4 = pnand %p406_p3, %p403_p2 }
  0x2b   :  { %411 = shalt.err (!%p408_p4)
}
  0x2c   :  { %s412_s0 = scalar_lea.vmem %s45_s23, 256  ;;  %p417_p6 = scmp.lt.s32.totalorder %s45_s23, %s45_s23 }
  0x2d   :  { %p413_p5 = scmp.ne.s32.totalorder %s45_s23, %s412_s0  ;;  %p418_p7 = scmp.lt.s32.totalorder %s412_s0, %s412_s0 }
  0x2f   :  { %p419_p8 = por %p418_p7, %p417_p6 }
  0x31   :  { %p420_p9 = pnand %p419_p8, %p413_p5 }
  0x33   :  { %423 = shalt.err (!%p420_p9)
}
  0x34   :  { %50 = dma.hbm_to_vmem [thread:$0]  %s625_s2, 256, %s45_s23, [#allocation6], %s478_s9, %s478_s9, %s479_s10  }
  0x35   :  { %s424_s15 = scalar_lea.hbm %s626_s3, 256 }
  0x36   :  { %p425_p10 = scmp.ne.s32.totalorder %s626_s3, %s424_s15  ;;  %p428_p11 = scmp.lt.u32.totalorder %s424_s15, %s626_s3 }
  0x38   :  { %p430_p12 = pnand %p428_p11, %p425_p10 }
  0x3a   :  { %433 = shalt.err (!%p430_p12)
}
  0x3b   :  { %s434_s20 = scalar_lea.vmem %s555_s26, 256  ;;  %p439_p0 = scmp.lt.s32.totalorder %s555_s26, %s555_s26 }
  0x3c   :  { %p435_p13 = scmp.ne.s32.totalorder %s555_s26, %s434_s20  ;;  %p440_p1 = scmp.lt.s32.totalorder %s434_s20, %s434_s20 }
  0x3e   :  { %p441_p2 = por %p440_p1, %p439_p0 }
  0x40   :  { %p442_p3 = pnand %p441_p2, %p435_p13 }
  0x42   :  { %445 = shalt.err (!%p442_p3)
}
  0x43   :  { %62 = dma.hbm_to_vmem [thread:$0]  %s626_s3, 256, %s555_s26, [#allocation9], %s478_s9, %s478_s9, %s479_s10  }
  0x44   :  { %468 = dma.done.wait [#allocation3], 256  }
  0x45   :  { %469 = vsyncadd [#allocation3], 4294967040 }
  0x46   :  { %470 = dma.done.wait [#allocation6], 512  }
  0x47   :  { %471 = vsyncadd [#allocation6], 4294966784 }
  0x48   :  { %472 = dma.done.wait [#allocation9], 256  }
  0x49   :  { %473 = vsyncadd [#allocation9], 4294967040  ;;  %vm258_vm0 = vcmask 261120   ;;  %v79_v0 = vld [vmem:[#allocation2] sm:$0xff]  ;;  %v80_v1 = vld [vmem:[#allocation2 + $0x8] sm:$0xff]  ;;  %vm92_vm1 = vcmask 130048  }
  0x4a   :  { %v83_v2 = vld [vmem:[#allocation7] sm:$0xff]  ;;  %v259_v3 = vsel %vm258_vm0, %v79_v0, 0.0  ;;  %v84_v4 = vld [vmem:[#allocation7 + $0x8] sm:$0xff]  ;;  %v174_v5 = vld [vmem:[#allocation8] sm:$0xff]  ;;  %v262_v10 = vsel %vm258_vm0, %v80_v1, 0.0  ;;  %s482_s25 = smov [#allocation10]  }
  0x4b   :  { %v175_v6 = vld [vmem:[#allocation8 + $0x8] sm:$0xff]  ;;  %260 = vadd.xlane.f32.xlu0 %v259_v3  ;;  %v339_v7 = vpack.c.bf16 %v84_v4, %v83_v2  ;;  %v81_v9 = vld [vmem:[#allocation5] sm:$0xff]  ;;  %v311_v32 = vld [vmem:[%s627_s4] ss:$0 sm:$0xff]  ;;  %s297_s26 = sshll.u32 %s482_s25, 4  ;;  %s298_s26 = int_to_ptr.vmem [resolvable:$true] %s297_s26 }
  0x4c   :  { %v343_v8 = vpack.c.bf16 %v175_v6, %v174_v5  ;;  %329 = vmatprep.mubr.msk.f32.mxu0 %vm92_vm1, %v81_v9  ;;  %336 = vmatprep.mubr.msk.f32.mxu1 %vm92_vm1, %v81_v9  ;;  %v82_v11 = vld [vmem:[#allocation5 + $0x8] sm:$0xff]  ;;  %v314_v33 = vld [vmem:[%s628_s5] ss:$0 sm:$0xff]  ;;  %s446_s4 = scalar_lea.vmem %s298_s26, 256  ;;  %p451_p5 = scmp.lt.s32.totalorder %s298_s26, %s298_s26 }
  0x4d   :  { %340 = vmatprep.subr.bf16.mxu0 %v339_v7  ;;  %p447_p4 = scmp.ne.s32.totalorder %s298_s26, %s446_s4  ;;  %p452_p6 = scmp.lt.s32.totalorder %s446_s4, %s446_s4 }
  0x4e   :  { %344 = vmatprep.subr.bf16.mxu1 %v343_v8  ;;  %342 = vmatpush3.bf16.msra.mxu0 %v339_v7 }
  0x4f   :  { %346 = vmatpush3.bf16.msra.mxu1 %v343_v8  ;;  %263 = vadd.xlane.f32.xlu0 %v262_v10  ;;  %p453_p7 = por %p452_p6, %p451_p5 }
  0x51   :  { %330 = vmatmul.mubr.msk.f32.vlgmr.msra.gmra.mrb[0].mxu0 %vm92_vm1, %v82_v11  ;;  %p454_p8 = pnand %p453_p7, %p447_p4 }
  0x52   :  { %337 = vmatmul.mubr.msk.f32.vlgmr.msra.gmra.mrb[0].mxu1 %vm92_vm1, %v82_v11 }
  0xd8   :  { %v261_v12 = vpop.xlane.xlu0 %260 }
  0xd9   :  { %v266_v13 = vmul.f32 0.03125, %v261_v12 }
  0xdb   :  { %v268_v14 = vsub.f32 %v79_v0, %v266_v13 }
  0xdc   :  { %v264_v15 = vpop.xlane.xlu0 %263 }
  0xdd   :  { %v267_v16 = vmul.f32 0.03125, %v264_v15  ;;  %v270_v17 = vmul.f32 %v268_v14, %v268_v14 }
  0xdf   :  { %v269_v18 = vsub.f32 %v80_v1, %v267_v16  ;;  %v272_v19 = vsel %vm258_vm0, %v270_v17, 0.0 }
  0xe0   :  { %273 = vadd.xlane.f32.xlu1 %v272_v19 }
  0xe1   :  { %v271_v20 = vmul.f32 %v269_v18, %v269_v18 }
  0xe3   :  { %v275_v21 = vsel %vm258_vm0, %v271_v20, 0.0 }
  0xe4   :  { %276 = vadd.xlane.f32.xlu1 %v275_v21 }
 0x124   :  { %v331_v22 = vpop.f32.mrb[0].mxu0 }
 0x125   :  { %v338_v23 = vpop.f32.mrb[0].mxu1  ;;  %v165_v24 = vpop.f32.mrb[1].mxu0  ;;  %v171_v38 = vadd.f32 %v331_v22, %v311_v32 }
 0x126   :  { %v249_v25 = vpop.f32.mrb[1].mxu1  ;;  %v166_v34 = vadd.f32 %v311_v32, %v165_v24  ;;  %v255_v42 = vadd.f32 %v338_v23, %v314_v33 }
 0x127   :  { %v250_v37 = vadd.f32 %v314_v33, %v249_v25 }
 0x16d   :  { %v274_v26 = vpop.xlane.xlu1 %273 }
 0x16e   :  { %v278_v27 = vmul.f32 0.03125, %v274_v26 }
 0x170   :  { %v280_v28 = vadd.f32 1e-05, %v278_v27 }
 0x171   :  { %v277_v29 = vpop.xlane.xlu1 %276 }
 0x172   :  { %354 = vrsqrt.f32 %v280_v28  ;;  %v279_v30 = vmul.f32 0.03125, %v277_v29 }
 0x174   :  { %v281_v31 = vadd.f32 1e-05, %v279_v30 }
 0x176   :  { %356 = vrsqrt.f32 %v281_v31 }
 0x17c   :  { %v355_v35 = vpop.eup %354 }
 0x17d   :  { %v284_v36 = vmul.f32 %v355_v35, %v268_v14 }
 0x17f   :  { %v286_v39 = vmul.f32 %v284_v36, %v166_v34 }
 0x180   :  { %v357_v40 = vpop.eup %356 }
 0x181   :  { %v285_v41 = vmul.f32 %v357_v40, %v269_v18  ;;  %v288_v43 = vadd.f32 %v286_v39, %v250_v37 }
 0x183   :  { %v287_v44 = vmul.f32 %v285_v41, %v171_v38  ;;  %290 = vst.msk [vmem:[#allocation10] sm:$0xff] %vm258_vm0, %v288_v43 }
 0x185   :  { %v289_v45 = vadd.f32 %v287_v44, %v255_v42 }
 0x187   :  { %291 = vst.msk [vmem:[#allocation10 + $0x8] sm:$0xff] %vm258_vm0, %v289_v45 }
 0x188   :  { %457 = shalt.err (!%p454_p8)
}
 0x189   :  { %s458_s28 = scalar_lea.hbm %s629_s6, 256 }
 0x18a   :  { %p459_p9 = scmp.ne.s32.totalorder %s629_s6, %s458_s28  ;;  %p462_p10 = scmp.lt.u32.totalorder %s458_s28, %s629_s6 }
 0x18c   :  { %p464_p11 = pnand %p462_p10, %p459_p9 }
 0x18e   :  { %467 = shalt.err (!%p464_p11)
}
 0x18f   :  { %303 = dma.vmem_to_hbm [thread:$0]  %s298_s26, 256, %s629_s6, [#allocation4], %s478_s9, %s478_s9, %s479_s10  }
 0x190   :  { %474 = dma.done.wait [#allocation4], 256  }
 0x191   :  { %475 = vsyncadd [#allocation4], 4294967040 }
 0x192   :  { %307 = vsyncpa [#allocation3], 1 }
 0x193   :  { %308 = vsyncpa [#allocation6], 1 }
 0x194   :  { %309 = vsyncpa [#allocation9], 1 }
 0x195   :  { %310 = vsyncpa [#allocation4], 1 }

</bundles_post_ra>
